<compile_context>
chip_gen: v6e
topology: v6e:2x2x1
jax: 0.10.0
libtpu: 0.0.40
codegen_flags: <defaults>
</compile_context>

<pallas_src>
import jax
import jax.numpy as jnp
from jax.experimental import pallas as pl
from jax.experimental.pallas import tpu as pltpu

KS = 3          # kernel_size per spatial dim
DIM = 2         # spatial dimension D
KV = KS ** DIM  # kernel_volume
PAD = (KS - 1) // 2


def _dw3x3_plane_kernel(x_ref, w_ref, o_ref, xpad_ref):
    # x_ref:    (H, W)   VMEM  one (n, c) spatial plane (W on lanes, H on sublanes)
    # w_ref:    (KV, C)  SMEM  channelwise kernel, kernel_1d_coord major
    # o_ref:    (H, W)   VMEM
    # xpad_ref: (H+2, W+2) VMEM scratch: zero-padded copy of the plane
    H, W = o_ref.shape
    c = pl.program_id(1)

    # Fused zero padding (replaces the wrapper-side jnp.pad HBM pass).
    # Re-initialized every grid step -> correct regardless of how the grid is
    # split across TensorCores.
    xpad_ref[...] = jnp.zeros_like(xpad_ref)
    xpad_ref[PAD:PAD + H, PAD:PAD + W] = x_ref[...]

    first = True
    for a in range(KS):          # dy + 1  (weight KS**1)
        for b in range(KS):      # dx + 1  (weight KS**0)
            kidx = a * KS + b    # == sum(index_array * kernel_coord)
            w = w_ref[kidx, c].astype(jnp.float32)      # scalar weight (SMEM)
            win = xpad_ref[a:a + H, b:b + W].astype(jnp.float32)
            contrib = (win * w).astype(o_ref.dtype)
            if first:
                o_ref[...] = contrib
                first = False
            else:
                o_ref[...] += contrib


def minkowski_channelwise_conv(x_nchw, kernel):
    """Dense-grid equivalent of CustomMinkowskiChannelwiseConvolution.forward.

    x_nchw: (N, C, H, W) float32   -- sparse features laid out on a dense grid
    kernel: (KV, C) float32        -- channelwise kernel (module's (KV, C, 1))
    Returns (N, C, H, W) = out_F rows re-arranged onto the dense output grid.
    """
    N, C, H, W = x_nchw.shape
    assert kernel.shape == (KV, C)

    # Whole (H, W) plane per grid step.  For very large planes this should be
    # further tiled along H with a halo; at these sizes one plane is tiny.
    return pl.pallas_call(
        _dw3x3_plane_kernel,
        out_shape=jax.ShapeDtypeStruct((N, C, H, W), x_nchw.dtype),
        grid_spec=pltpu.PrefetchScalarGridSpec(
            num_scalar_prefetch=0,
            grid=(N, C),
            in_specs=[
                pl.BlockSpec((None, None, H, W), lambda n, c: (n, c, 0, 0)),
                pl.BlockSpec(memory_space=pltpu.MemorySpace.SMEM),
            ],
            out_specs=pl.BlockSpec((None, None, H, W), lambda n, c: (n, c, 0, 0)),
            scratch_shapes=[
                pltpu.VMEM((H + 2 * PAD, W + 2 * PAD), x_nchw.dtype),
            ],
        ),
        compiler_params=pltpu.CompilerParams(
            dimension_semantics=("parallel", "parallel")),
    )(x_nchw, kernel)


def _reference(x_nchw, kernel):
    """Pure-JAX reference of the same dense-grid channelwise conv."""
    N, C, H, W = x_nchw.shape
    xp = jnp.pad(x_nchw, ((0, 0), (0, 0), (PAD, PAD), (PAD, PAD)))
    out = jnp.zeros_like(x_nchw)
    for a in range(KS):
        for b in range(KS):
            kidx = a * KS + b
            out = out + xp[:, :, a:a + H, b:b + W] * kernel[kidx][None, :, None, None]
    return out


if __name__ == "__main__":
    key = jax.random.PRNGKey(0)
    kx, kw = jax.random.split(key)

    N, C, H, W = 2, 4, 16, 16
    x = jax.random.normal(kx, (N, C, H, W), dtype=jnp.float32)
    # Deterministic channelwise kernel, shape (kernel_volume, C)
    # (== module's 3-D kernel (KV, C, 1) with the trailing singleton squeezed).
    kernel = jax.random.normal(kw, (KV, C), dtype=jnp.float32)

    out = minkowski_channelwise_conv(x, kernel)
    out = jax.block_until_ready(out)

    ref = _reference(x, kernel)
    assert out.shape == (N, C, H, W)
    assert jnp.allclose(out, ref, atol=1e-5, rtol=1e-5), "mismatch vs reference"

    print("KERNEL_OK")
</pallas_src>

<mosaic_0001>
module attributes {stable_mosaic.version = 11 : i64} {
  func.func @_dw3x3_plane_kernel(%arg0: i32, %arg1: i32, %arg2: memref<1x1x16x16xf32, #tpu.memory_space<vmem>>, %arg3: memref<9x4xf32, #tpu.memory_space<smem>>, %arg4: memref<1x1x16x16xf32, #tpu.memory_space<vmem>>, %arg5: memref<18x18xf32, #tpu.memory_space<vmem>>) attributes {dimension_semantics = [#tpu.dimension_semantics<parallel>, #tpu.dimension_semantics<parallel>], iteration_bounds = array<i64: 2, 4>, scalar_prefetch = 0 : i64, scratch_operands = 1 : i64, tpu.core_type = #tpu.core_type<tc>, window_params = [{transform_indices = @transform_0, window_bounds = array<i64: 1, 1, 16, 16>}, {transform_indices = @transform_1, window_bounds = array<i64: 9, 4>}, {transform_indices = @transform_2, window_bounds = array<i64: 1, 1, 16, 16>}]} {
    %cst = arith.constant 0.000000e+00 : f32
    %0 = vector.broadcast %cst : f32 to vector<18x18xf32>
    %c0 = arith.constant 0 : index
    %c0_0 = arith.constant 0 : index
    %1 = vector.load %arg5[%c0, %c0_0] : memref<18x18xf32, #tpu.memory_space<vmem>>, vector<18x18xf32>
    tpu.vector_store %arg5[%c0, %c0_0], %0 {strides = array<i32>} : memref<18x18xf32, #tpu.memory_space<vmem>>, vector<18x18xf32>,
    %c0_1 = arith.constant 0 : index
    %c0_2 = arith.constant 0 : index
    %c0_3 = arith.constant 0 : index
    %c0_4 = arith.constant 0 : index
    %2 = vector.load %arg2[%c0_1, %c0_2, %c0_3, %c0_4] : memref<1x1x16x16xf32, #tpu.memory_space<vmem>>, vector<1x1x16x16xf32>
    %3 = vector.shape_cast %2 : vector<1x1x16x16xf32> to vector<16x16xf32>
    %c1 = arith.constant 1 : index
    %c1_5 = arith.constant 1 : index
    %4 = vector.load %arg5[%c1, %c1_5] : memref<18x18xf32, #tpu.memory_space<vmem>>, vector<16x16xf32>
    tpu.vector_store %arg5[%c1, %c1_5], %3 {strides = array<i32>} : memref<18x18xf32, #tpu.memory_space<vmem>>, vector<16x16xf32>,
    %c0_6 = arith.constant 0 : index
    %5 = arith.index_cast %arg1 : i32 to index
    %6 = memref.load %arg3[%c0_6, %5] : memref<9x4xf32, #tpu.memory_space<smem>>
    %c0_7 = arith.constant 0 : index
    %c0_8 = arith.constant 0 : index
    %7 = vector.load %arg5[%c0_7, %c0_8] : memref<18x18xf32, #tpu.memory_space<vmem>>, vector<16x16xf32>
    %8 = vector.broadcast %6 : f32 to vector<16x16xf32>
    %9 = arith.mulf %7, %8 : vector<16x16xf32>
    %c0_9 = arith.constant 0 : index
    %c0_10 = arith.constant 0 : index
    %c0_11 = arith.constant 0 : index
    %c0_12 = arith.constant 0 : index
    %10 = vector.load %arg4[%c0_9, %c0_10, %c0_11, %c0_12] : memref<1x1x16x16xf32, #tpu.memory_space<vmem>>, vector<1x1x16x16xf32>
    %11 = vector.shape_cast %10 : vector<1x1x16x16xf32> to vector<16x16xf32>
    %12 = vector.shape_cast %9 : vector<16x16xf32> to vector<1x1x16x16xf32>
    tpu.vector_store %arg4[%c0_9, %c0_10, %c0_11, %c0_12], %12 {strides = array<i32>} : memref<1x1x16x16xf32, #tpu.memory_space<vmem>>, vector<1x1x16x16xf32>,
    %c1_13 = arith.constant 1 : index
    %13 = arith.index_cast %arg1 : i32 to index
    %14 = memref.load %arg3[%c1_13, %13] : memref<9x4xf32, #tpu.memory_space<smem>>
    %c0_14 = arith.constant 0 : index
    %c1_15 = arith.constant 1 : index
    %15 = vector.load %arg5[%c0_14, %c1_15] : memref<18x18xf32, #tpu.memory_space<vmem>>, vector<16x16xf32>
    %16 = vector.broadcast %14 : f32 to vector<16x16xf32>
    %17 = arith.mulf %15, %16 : vector<16x16xf32>
    %c0_16 = arith.constant 0 : index
    %c0_17 = arith.constant 0 : index
    %c0_18 = arith.constant 0 : index
    %c0_19 = arith.constant 0 : index
    %18 = vector.load %arg4[%c0_16, %c0_17, %c0_18, %c0_19] : memref<1x1x16x16xf32, #tpu.memory_space<vmem>>, vector<1x1x16x16xf32>
    %19 = vector.shape_cast %18 : vector<1x1x16x16xf32> to vector<16x16xf32>
    %20 = arith.addf %19, %17 : vector<16x16xf32>
    %c0_20 = arith.constant 0 : index
    %c0_21 = arith.constant 0 : index
    %c0_22 = arith.constant 0 : index
    %c0_23 = arith.constant 0 : index
    %21 = vector.load %arg4[%c0_20, %c0_21, %c0_22, %c0_23] : memref<1x1x16x16xf32, #tpu.memory_space<vmem>>, vector<1x1x16x16xf32>
    %22 = vector.shape_cast %21 : vector<1x1x16x16xf32> to vector<16x16xf32>
    %23 = vector.shape_cast %20 : vector<16x16xf32> to vector<1x1x16x16xf32>
    tpu.vector_store %arg4[%c0_20, %c0_21, %c0_22, %c0_23], %23 {strides = array<i32>} : memref<1x1x16x16xf32, #tpu.memory_space<vmem>>, vector<1x1x16x16xf32>,
    %c2 = arith.constant 2 : index
    %24 = arith.index_cast %arg1 : i32 to index
    %25 = memref.load %arg3[%c2, %24] : memref<9x4xf32, #tpu.memory_space<smem>>
    %c0_24 = arith.constant 0 : index
    %c2_25 = arith.constant 2 : index
    %26 = vector.load %arg5[%c0_24, %c2_25] : memref<18x18xf32, #tpu.memory_space<vmem>>, vector<16x16xf32>
    %27 = vector.broadcast %25 : f32 to vector<16x16xf32>
    %28 = arith.mulf %26, %27 : vector<16x16xf32>
    %c0_26 = arith.constant 0 : index
    %c0_27 = arith.constant 0 : index
    %c0_28 = arith.constant 0 : index
    %c0_29 = arith.constant 0 : index
    %29 = vector.load %arg4[%c0_26, %c0_27, %c0_28, %c0_29] : memref<1x1x16x16xf32, #tpu.memory_space<vmem>>, vector<1x1x16x16xf32>
    %30 = vector.shape_cast %29 : vector<1x1x16x16xf32> to vector<16x16xf32>
    %31 = arith.addf %30, %28 : vector<16x16xf32>
    %c0_30 = arith.constant 0 : index
    %c0_31 = arith.constant 0 : index
    %c0_32 = arith.constant 0 : index
    %c0_33 = arith.constant 0 : index
    %32 = vector.load %arg4[%c0_30, %c0_31, %c0_32, %c0_33] : memref<1x1x16x16xf32, #tpu.memory_space<vmem>>, vector<1x1x16x16xf32>
    %33 = vector.shape_cast %32 : vector<1x1x16x16xf32> to vector<16x16xf32>
    %34 = vector.shape_cast %31 : vector<16x16xf32> to vector<1x1x16x16xf32>
    tpu.vector_store %arg4[%c0_30, %c0_31, %c0_32, %c0_33], %34 {strides = array<i32>} : memref<1x1x16x16xf32, #tpu.memory_space<vmem>>, vector<1x1x16x16xf32>,
    %c3 = arith.constant 3 : index
    %35 = arith.index_cast %arg1 : i32 to index
    %36 = memref.load %arg3[%c3, %35] : memref<9x4xf32, #tpu.memory_space<smem>>
    %c1_34 = arith.constant 1 : index
    %c0_35 = arith.constant 0 : index
    %37 = vector.load %arg5[%c1_34, %c0_35] : memref<18x18xf32, #tpu.memory_space<vmem>>, vector<16x16xf32>
    %38 = vector.broadcast %36 : f32 to vector<16x16xf32>
    %39 = arith.mulf %37, %38 : vector<16x16xf32>
    %c0_36 = arith.constant 0 : index
    %c0_37 = arith.constant 0 : index
    %c0_38 = arith.constant 0 : index
    %c0_39 = arith.constant 0 : index
    %40 = vector.load %arg4[%c0_36, %c0_37, %c0_38, %c0_39] : memref<1x1x16x16xf32, #tpu.memory_space<vmem>>, vector<1x1x16x16xf32>
    %41 = vector.shape_cast %40 : vector<1x1x16x16xf32> to vector<16x16xf32>
    %42 = arith.addf %41, %39 : vector<16x16xf32>
    %c0_40 = arith.constant 0 : index
    %c0_41 = arith.constant 0 : index
    %c0_42 = arith.constant 0 : index
    %c0_43 = arith.constant 0 : index
    %43 = vector.load %arg4[%c0_40, %c0_41, %c0_42, %c0_43] : memref<1x1x16x16xf32, #tpu.memory_space<vmem>>, vector<1x1x16x16xf32>
    %44 = vector.shape_cast %43 : vector<1x1x16x16xf32> to vector<16x16xf32>
    %45 = vector.shape_cast %42 : vector<16x16xf32> to vector<1x1x16x16xf32>
    tpu.vector_store %arg4[%c0_40, %c0_41, %c0_42, %c0_43], %45 {strides = array<i32>} : memref<1x1x16x16xf32, #tpu.memory_space<vmem>>, vector<1x1x16x16xf32>,
    %c4 = arith.constant 4 : index
    %46 = arith.index_cast %arg1 : i32 to index
    %47 = memref.load %arg3[%c4, %46] : memref<9x4xf32, #tpu.memory_space<smem>>
    %c1_44 = arith.constant 1 : index
    %c1_45 = arith.constant 1 : index
    %48 = vector.load %arg5[%c1_44, %c1_45] : memref<18x18xf32, #tpu.memory_space<vmem>>, vector<16x16xf32>
    %49 = vector.broadcast %47 : f32 to vector<16x16xf32>
    %50 = arith.mulf %48, %49 : vector<16x16xf32>
    %c0_46 = arith.constant 0 : index
    %c0_47 = arith.constant 0 : index
    %c0_48 = arith.constant 0 : index
    %c0_49 = arith.constant 0 : index
    %51 = vector.load %arg4[%c0_46, %c0_47, %c0_48, %c0_49] : memref<1x1x16x16xf32, #tpu.memory_space<vmem>>, vector<1x1x16x16xf32>
    %52 = vector.shape_cast %51 : vector<1x1x16x16xf32> to vector<16x16xf32>
    %53 = arith.addf %52, %50 : vector<16x16xf32>
    %c0_50 = arith.constant 0 : index
    %c0_51 = arith.constant 0 : index
    %c0_52 = arith.constant 0 : index
    %c0_53 = arith.constant 0 : index
    %54 = vector.load %arg4[%c0_50, %c0_51, %c0_52, %c0_53] : memref<1x1x16x16xf32, #tpu.memory_space<vmem>>, vector<1x1x16x16xf32>
    %55 = vector.shape_cast %54 : vector<1x1x16x16xf32> to vector<16x16xf32>
    %56 = vector.shape_cast %53 : vector<16x16xf32> to vector<1x1x16x16xf32>
    tpu.vector_store %arg4[%c0_50, %c0_51, %c0_52, %c0_53], %56 {strides = array<i32>} : memref<1x1x16x16xf32, #tpu.memory_space<vmem>>, vector<1x1x16x16xf32>,
    %c5 = arith.constant 5 : index
    %57 = arith.index_cast %arg1 : i32 to index
    %58 = memref.load %arg3[%c5, %57] : memref<9x4xf32, #tpu.memory_space<smem>>
    %c1_54 = arith.constant 1 : index
    %c2_55 = arith.constant 2 : index
    %59 = vector.load %arg5[%c1_54, %c2_55] : memref<18x18xf32, #tpu.memory_space<vmem>>, vector<16x16xf32>
    %60 = vector.broadcast %58 : f32 to vector<16x16xf32>
    %61 = arith.mulf %59, %60 : vector<16x16xf32>
    %c0_56 = arith.constant 0 : index
    %c0_57 = arith.constant 0 : index
    %c0_58 = arith.constant 0 : index
    %c0_59 = arith.constant 0 : index
    %62 = vector.load %arg4[%c0_56, %c0_57, %c0_58, %c0_59] : memref<1x1x16x16xf32, #tpu.memory_space<vmem>>, vector<1x1x16x16xf32>
    %63 = vector.shape_cast %62 : vector<1x1x16x16xf32> to vector<16x16xf32>
    %64 = arith.addf %63, %61 : vector<16x16xf32>
    %c0_60 = arith.constant 0 : index
    %c0_61 = arith.constant 0 : index
    %c0_62 = arith.constant 0 : index
    %c0_63 = arith.constant 0 : index
    %65 = vector.load %arg4[%c0_60, %c0_61, %c0_62, %c0_63] : memref<1x1x16x16xf32, #tpu.memory_space<vmem>>, vector<1x1x16x16xf32>
    %66 = vector.shape_cast %65 : vector<1x1x16x16xf32> to vector<16x16xf32>
    %67 = vector.shape_cast %64 : vector<16x16xf32> to vector<1x1x16x16xf32>
    tpu.vector_store %arg4[%c0_60, %c0_61, %c0_62, %c0_63], %67 {strides = array<i32>} : memref<1x1x16x16xf32, #tpu.memory_space<vmem>>, vector<1x1x16x16xf32>,
    %c6 = arith.constant 6 : index
    %68 = arith.index_cast %arg1 : i32 to index
    %69 = memref.load %arg3[%c6, %68] : memref<9x4xf32, #tpu.memory_space<smem>>
    %c2_64 = arith.constant 2 : index
    %c0_65 = arith.constant 0 : index
    %70 = vector.load %arg5[%c2_64, %c0_65] : memref<18x18xf32, #tpu.memory_space<vmem>>, vector<16x16xf32>
    %71 = vector.broadcast %69 : f32 to vector<16x16xf32>
    %72 = arith.mulf %70, %71 : vector<16x16xf32>
    %c0_66 = arith.constant 0 : index
    %c0_67 = arith.constant 0 : index
    %c0_68 = arith.constant 0 : index
    %c0_69 = arith.constant 0 : index
    %73 = vector.load %arg4[%c0_66, %c0_67, %c0_68, %c0_69] : memref<1x1x16x16xf32, #tpu.memory_space<vmem>>, vector<1x1x16x16xf32>
    %74 = vector.shape_cast %73 : vector<1x1x16x16xf32> to vector<16x16xf32>
    %75 = arith.addf %74, %72 : vector<16x16xf32>
    %c0_70 = arith.constant 0 : index
    %c0_71 = arith.constant 0 : index
    %c0_72 = arith.constant 0 : index
    %c0_73 = arith.constant 0 : index
    %76 = vector.load %arg4[%c0_70, %c0_71, %c0_72, %c0_73] : memref<1x1x16x16xf32, #tpu.memory_space<vmem>>, vector<1x1x16x16xf32>
    %77 = vector.shape_cast %76 : vector<1x1x16x16xf32> to vector<16x16xf32>
    %78 = vector.shape_cast %75 : vector<16x16xf32> to vector<1x1x16x16xf32>
    tpu.vector_store %arg4[%c0_70, %c0_71, %c0_72, %c0_73], %78 {strides = array<i32>} : memref<1x1x16x16xf32, #tpu.memory_space<vmem>>, vector<1x1x16x16xf32>,
    %c7 = arith.constant 7 : index
    %79 = arith.index_cast %arg1 : i32 to index
    %80 = memref.load %arg3[%c7, %79] : memref<9x4xf32, #tpu.memory_space<smem>>
    %c2_74 = arith.constant 2 : index
    %c1_75 = arith.constant 1 : index
    %81 = vector.load %arg5[%c2_74, %c1_75] : memref<18x18xf32, #tpu.memory_space<vmem>>, vector<16x16xf32>
    %82 = vector.broadcast %80 : f32 to vector<16x16xf32>
    %83 = arith.mulf %81, %82 : vector<16x16xf32>
    %c0_76 = arith.constant 0 : index
    %c0_77 = arith.constant 0 : index
    %c0_78 = arith.constant 0 : index
    %c0_79 = arith.constant 0 : index
    %84 = vector.load %arg4[%c0_76, %c0_77, %c0_78, %c0_79] : memref<1x1x16x16xf32, #tpu.memory_space<vmem>>, vector<1x1x16x16xf32>
    %85 = vector.shape_cast %84 : vector<1x1x16x16xf32> to vector<16x16xf32>
    %86 = arith.addf %85, %83 : vector<16x16xf32>
    %c0_80 = arith.constant 0 : index
    %c0_81 = arith.constant 0 : index
    %c0_82 = arith.constant 0 : index
    %c0_83 = arith.constant 0 : index
    %87 = vector.load %arg4[%c0_80, %c0_81, %c0_82, %c0_83] : memref<1x1x16x16xf32, #tpu.memory_space<vmem>>, vector<1x1x16x16xf32>
    %88 = vector.shape_cast %87 : vector<1x1x16x16xf32> to vector<16x16xf32>
    %89 = vector.shape_cast %86 : vector<16x16xf32> to vector<1x1x16x16xf32>
    tpu.vector_store %arg4[%c0_80, %c0_81, %c0_82, %c0_83], %89 {strides = array<i32>} : memref<1x1x16x16xf32, #tpu.memory_space<vmem>>, vector<1x1x16x16xf32>,
    %c8 = arith.constant 8 : index
    %90 = arith.index_cast %arg1 : i32 to index
    %91 = memref.load %arg3[%c8, %90] : memref<9x4xf32, #tpu.memory_space<smem>>
    %c2_84 = arith.constant 2 : index
    %c2_85 = arith.constant 2 : index
    %92 = vector.load %arg5[%c2_84, %c2_85] : memref<18x18xf32, #tpu.memory_space<vmem>>, vector<16x16xf32>
    %93 = vector.broadcast %91 : f32 to vector<16x16xf32>
    %94 = arith.mulf %92, %93 : vector<16x16xf32>
    %c0_86 = arith.constant 0 : index
    %c0_87 = arith.constant 0 : index
    %c0_88 = arith.constant 0 : index
    %c0_89 = arith.constant 0 : index
    %95 = vector.load %arg4[%c0_86, %c0_87, %c0_88, %c0_89] : memref<1x1x16x16xf32, #tpu.memory_space<vmem>>, vector<1x1x16x16xf32>
    %96 = vector.shape_cast %95 : vector<1x1x16x16xf32> to vector<16x16xf32>
    %97 = arith.addf %96, %94 : vector<16x16xf32>
    %c0_90 = arith.constant 0 : index
    %c0_91 = arith.constant 0 : index
    %c0_92 = arith.constant 0 : index
    %c0_93 = arith.constant 0 : index
    %98 = vector.load %arg4[%c0_90, %c0_91, %c0_92, %c0_93] : memref<1x1x16x16xf32, #tpu.memory_space<vmem>>, vector<1x1x16x16xf32>
    %99 = vector.shape_cast %98 : vector<1x1x16x16xf32> to vector<16x16xf32>
    %100 = vector.shape_cast %97 : vector<16x16xf32> to vector<1x1x16x16xf32>
    tpu.vector_store %arg4[%c0_90, %c0_91, %c0_92, %c0_93], %100 {strides = array<i32>} : memref<1x1x16x16xf32, #tpu.memory_space<vmem>>, vector<1x1x16x16xf32>,
    return
  }
  func.func @transform_0(%arg0: i32, %arg1: i32) -> (i32, i32, i32, i32) {
    %c0_i32 = arith.constant 0 : i32
    %c0_i32_0 = arith.constant 0 : i32
    %c0_i32_1 = arith.constant 0 : i32
    return %arg0, %arg1, %c0_i32, %c0_i32_0 : i32, i32, i32, i32
  }
  func.func @transform_1(%arg0: i32, %arg1: i32) -> (i32, i32) {
    %c0_i32 = arith.constant 0 : i32
    %c0_i32_0 = arith.constant 0 : i32
    %c0_i32_1 = arith.constant 0 : i32
    return %c0_i32, %c0_i32_0 : i32, i32
  }
  func.func @transform_2(%arg0: i32, %arg1: i32) -> (i32, i32, i32, i32) {
    %c0_i32 = arith.constant 0 : i32
    %c0_i32_0 = arith.constant 0 : i32
    %c0_i32_1 = arith.constant 0 : i32
    return %arg0, %arg1, %c0_i32, %c0_i32_0 : i32, i32, i32, i32
  }
}

</mosaic_0001>

<bundles_post_ra>
// kernel: tpu_custom_call.1
= control target key start
LH: loop header
LB: loop body
LE: loop exit
PB: predicated region body
PF: predicated region fallthrough
CT: control target
= control target key end

     0   :  { %s1153_s0 = inlined_call_operand.hbm [shape: f32[2,4,16,16], index: 0, kind: input, shape index: {}]   ;;  %s1154_s1 = inlined_call_operand.vmem [shape: f32[9,4], index: 1, kind: input, shape index: {}]   ;;  %s1155_s2 = inlined_call_operand.hbm [shape: f32[2,4,16,16], index: 2, kind: output, shape index: {}]  }
   0x1   :  { %1161 = sst [smem:[#allocation15_spill]] %s1154_s1 }
   0x2   :  { %7 = vsyncpa [#allocation4], 0 }
   0x3   :  { %9 = vsyncpa [#allocation4 + $0x1], 0 }
   0x4   :  { %10 = vsyncpa [#allocation6], 0 }
   0x5   :  { %11 = vsyncpa [#allocation5], 0 }
   0x6   :  { %13 = vsyncpa [#allocation5 + $0x1], 0  ;;  %s824_s9 = smov 0   ;;  %s826_s10 = smov 0  }
   0x7   :  { %s828_s11 = smov 0   ;;  %s830_s12 = smov 0  }
   0x8   :  { %s832_s13 = smov 0   ;;  %s834_s14 = smov 0  }
   0x9   :  { %s836_s15 = smov 0   ;;  %s838_s16 = smov 0  }
   0xa LB: > { %1162 = sst [smem:[#allocation12_spill]] %s788_s14  ;;  %s513_s17 = sadd.s32 4294967295, %s796_s16   ;;  %s796_s16 = sphi %s838_s16, %s19_s16   ;;  %s792_s15 = sphi %s836_s15, %s1185_s15   ;;  %s788_s14 = sphi %s834_s14, %s1180_s14   ;;  %s784_s13 = sphi %s832_s13, %s1184_s13   ;;  %s780_s12 = sphi %s830_s12, %s1179_s12   ;;  %s776_s11 = sphi %s828_s11, %s1183_s11   ;;  %s772_s10 = sphi %s826_s10, %s1182_s10   ;;  %s768_s9 = sphi %s824_s9, %s1181_s9  }
   0xb   : > { %s514_s18 = sadd.s32 4294967294, %s796_s16   ;;  %p53_p0 = scmp.ne.s32.totalorder %s772_s10, %s768_s9 }
   0xc   : > { %p868_p1 = scmp.eq.s32.totalorder %s513_s17, 0  ;;  %p872_p2 = scmp.eq.s32.totalorder %s513_s17, 7 }
   0xd   : > { %p106_p3 = scmp.eq.s32.totalorder %s514_s18, 7  ;;  %p515_p5 = scmp.ge.s32.totalorder %s796_s16, 1 }
   0xe   : > { %p878_p4 = por %p868_p1, %p53_p0  ;;  %p113_p7 = scmp.lt.s32.totalorder %s796_s16, 9 }
   0xf   : > { %p883_p6 = por %p106_p3, %p53_p0  ;;  %s1168_s1 = sld [smem:[#allocation15_spill]] }
  0x10   : > { %p891_p8 = pnand %p515_p5, %p113_p7 }
  0x11   : > { %s1166_s22 = scalar_select %p883_p6, 1, 0 }
  0x12   : > { %p564_p9 = pneg %p891_p8 }
  0x13   : > { %1167 = sst [smem:[#allocation13_spill]] %s1166_s22 }
  0x14   : > { %p899_p10 = pnand %p564_p9, %p868_p1 }
  0x15   : > { %s125_s25 = sshll.u32 %s1168_s1, 4  ;;  %s126_s25 = int_to_ptr.vmem [resolvable:$true] %s125_s25 }
  0x16   : > { %s653_s28 = scalar_lea.vmem %s126_s25, 256  ;;  %p655_p12 = pneg %p899_p10 }
  0x17   : > { %p654_p11 = scmp.ne.s32.totalorder %s126_s25, %s653_s28  ;;  %p661_p3 = scmp.lt.s32.totalorder %s126_s25, %s126_s25 }
  0x18   : > { %p662_p5 = scmp.lt.s32.totalorder %s653_s28, %s653_s28 }
  0x19   : > { %p656_p13 = pnand %p655_p12, %p654_p11 }
  0x1a   : > { %p663_p7 = por %p662_p5, %p661_p3 }
  0x1b   : > { %p657_p0 = pneg %p656_p13 }
  0x1d   : > { %p664_p6 = pnand %p663_p7, %p657_p0 }
  0x1f   : > { %667 = shalt.err (!%p664_p6)
}
  0x20   : > { %s798_s29 = smov [#allocation7]   ;;  %s1156_s30 = smov 128  }
  0x21   : > { %s1157_s3 = smov 8   ;;  %s28_s4 = sadd.s32 1, %s788_s14 }
  0x22   : > { %567 = dma.vmem_to_smem (!%p899_p10), %s126_s25, 256, %s798_s29, [#allocation6], %s1156_s30, %s1156_s30, %s1157_s3  }
  0x23   : > { %p29_p6 = scmp.ge.s32.totalorder %s28_s4, 4  ;;  %s31_s5 = sadd.s32 1, %s792_s15 }
  0x24   : > { %s40_s6 = sadd.s32 1, %s776_s11  ;;  %p47_p9 = scmp.ne.s32.totalorder %s776_s11, %s772_s10 }
  0x25   : > { %s1187_s4 = smov (%p29_p6, %s28_s4), 0  ;;  %s1189_s5 = smov (!%p29_p6, %s31_s5), %s792_s15 }
  0x26   : > { %1171 = sst [smem:[#allocation14_spill]] %s1187_s4  ;;  %s36_s7 = ssub.s32 %s788_s14, %s1187_s4 }
  0x27   : > { %p48_p11 = scmp.eq.s32.totalorder %s796_s16, 0  ;;  %p33_p12 = scmp.ge.s32.totalorder %s1189_s5, 2 }
  0x28   : > { %p923_p13 = por %p872_p2, %p47_p9  ;;  %p577_p0 = scmp.lt.s32.totalorder %s796_s16, 8 }
  0x29   : > { %p927_p10 = por %p48_p11, %p47_p9  ;;  %s1191_s5 = smov (%p33_p12, %s1189_s5), 0 }
  0x2a   : > { %s139_s18 = sand.u32 1, %s776_s11   ;;  %s519_s23 = sshll.u32 %s788_s14, 1 }
  0x2b   : > { %s35_s24 = ssub.s32 %s792_s15, %s1191_s5  ;;  %s518_s27 = sshll.u32 %s139_s18, 4 }
  0x2c   : > { %s37_s25 = sor.u32 %s36_s7, %s35_s24  ;;  %s520_s20 = sshll.u32 %s792_s15, 3 }
  0x2d   : > { %p38_p3 = scmp.eq.s32.totalorder %s37_s25, 0  ;;  %s143_s28 = scalar_lea.vmem [#allocation3], %s518_s27 }
  0x2e   : > { %s152_s29 = sshll.u32 %s143_s28, 4  ;;  %s149_s3 = sadd.s32 %s520_s20, %s519_s23  ;;  %s153_s29 = int_to_ptr.vmem [resolvable:$true] %s152_s29 }
  0x2f   : > { %s940_s30 = scalar_select %p38_p3, %s776_s11, %s40_s6  }
  0x30   : > { %s521_s1 = sshll.u32 %s149_s3, 7  ;;  %p946_p2 = pnand %p577_p0, %p927_p10 }
  0x31   : > { %s151_s7 = scalar_lea.hbm %s1153_s0, %s521_s1  ;;  %s140_s24 = scalar_lea.sflag [#allocation4], %s139_s18 }
  0x32   : > { %p670_p5 = pneg %p946_p2  ;;  %s681_s25 = scalar_lea.vmem %s153_s29, 256 }
  0x33   : > { %p682_p7 = scmp.ne.s32.totalorder %s153_s29, %s681_s25  ;;  %s801_s6 = smov [#allocation3]  }
  0x34   : > { %s686_s3 = sshll.u32 %s801_s6, 4  ;;  %s687_s3 = int_to_ptr.vmem [resolvable:$false] %s686_s3 }
  0x35   : > { %p684_p6 = pnand %p682_p7, %p670_p5  ;;  %s688_s17 = scalar_lea.vmem %s687_s3, 512 }
  0x36   : > { %p689_p11 = scmp.lt.s32.totalorder %s153_s29, %s687_s3  ;;  %p690_p12 = scmp.lt.s32.totalorder %s688_s17, %s681_s25 }
  0x37   : > { %p685_p9 = pneg %p684_p6 }
  0x38   : > { %p691_p10 = por %p690_p12, %p689_p11 }
  0x3a   : > { %p692_p0 = pnand %p691_p10, %p685_p9 }
  0x3c   : > { %695 = shalt.err (!%p692_p0)
}
  0x3d   : > { %s1175_s14 = smov 8   ;;  %s1176_s1 = smov 128  }
  0x3e   : > { %571 = dma.hbm_to_vmem [thread:$0]  (!%p946_p2), %s151_s7, 256, %s153_s29, %s140_s24, %s1176_s1, %s1176_s1, %s1175_s14  }
  0x3f   : > { %164 = sbr.rel (%p891_p8) target bundleno = 404 (0x194), region = 28  ;;  %s963_s22 = sand.u32 (!%p891_p8), 1, %s772_s10  }
  0x40   : > { %s523_s18 = sshll.u32 (!%p891_p8), %s963_s22, 4  ;;  %s167_s23 = scalar_lea.sflag (!%p891_p8), [#allocation4], %s963_s22 }
  0x41   : > { %s170_s27 = scalar_lea.vmem (!%p891_p8), [#allocation3], %s523_s18 }
  0x44   : > { %755 = dma.done.wait (%p878_p4), %s167_s23, 256  }
  0x45   : > { %757 = vsyncadd (%p878_p4), %s167_s23, 4294967040 }
  0x46   : > { %759 = dma.done.wait (%p868_p1), [#allocation6], 256  }
  0x47   : > { %761 = vsyncadd (%p868_p1), [#allocation6], 4294967040 }
  0x48   : > { %179 = sfence }
  0x49   : > { %v201_v0 = vld [vmem:[%s170_s27] sm:$0xff]  ;;  %vm196_vm0 = vcmask 146432   ;;  %s802_s26 = smov 1   ;;  %v803_v1 = vmov 0.0   ;;  %vm199_vm1 = vcmask 140288   ;;  %v202_v2 = vld [vmem:[%s170_s27 + $0x8] sm:$0xff] }
  0x4a   : > { %205 = vrot.lane.b32.xlu0 %v201_v0, %s802_s26  ;;  %197 = vst.msk [vmem:[#allocation2] sm:$0xff] %vm196_vm0, %v803_v1  ;;  %198 = vst.msk [vmem:[#allocation2 + $0x8] sm:$0xff] %vm196_vm0, %v803_v1  ;;  %s223_s21 = sshra.s32 %s780_s12, 7  ;;  %s981_s19 = sand.u32 127, %s780_s12  ;;  %vm211_vm2 = vcmask 138248   ;;  %vm220_vm3 = vcmask 130048  }
  0x4b   : > { %200 = vst.msk [vmem:[#allocation2 + $0x10] sm:$0x3] %vm199_vm1, %v803_v1  ;;  %s978_s4 = sshll.u32 %s223_s21, 7  ;;  %s997_s23 = sld [smem:[#allocation7 + %s780_s12]] }
  0x4c   : > { %s545_s20 = sadd.s32 384, %s978_s4  ;;  %s551_s29 = sadd.s32 768, %s978_s4 }
  0x4d   : > { %s275_s28 = sadd.s32 %s545_s20, %s981_s19  ;;  %s336_s7 = sadd.s32 %s551_s29, %s981_s19 }
  0x4e   : > { %207 = vrot.lane.b32.xlu0 %v202_v2, %s802_s26  ;;  %s543_s24 = sadd.s32 256, %s978_s4  ;;  %s541_s25 = sadd.s32 128, %s978_s4 }
  0x4f   : > { %s252_s6 = sadd.s32 %s543_s24, %s981_s19  ;;  %s229_s3 = sadd.s32 %s541_s25, %s981_s19 }
  0x50   : > { %s991_s17 = sld [smem:[#allocation7 + %s252_s6]]  ;;  %s547_s14 = sadd.s32 512, %s978_s4 }
  0x51   : > { %s994_s1 = sld [smem:[#allocation7 + %s229_s3]]  ;;  %s290_s27 = sadd.s32 %s547_s14, %s981_s19  ;;  %v217_v7 = vstv %s997_s23 }
  0x52   : > { %s1000_s26 = sld [smem:[#allocation7 + %s275_s28]]  ;;  %s549_s21 = sadd.s32 640, %s978_s4 }
  0x53   : > { %s1003_s20 = sld [smem:[#allocation7 + %s290_s27]]  ;;  %s313_s29 = sadd.s32 %s549_s21, %s981_s19 }
  0x54   : > { %s553_s24 = sadd.s32 896, %s978_s4  ;;  %s1007_s25 = sld [smem:[#allocation7 + %s336_s7]] }
  0x55   : > { %s1011_s6 = sld [smem:[#allocation7 + %s313_s29]]  ;;  %s351_s28 = sadd.s32 %s553_s24, %s981_s19 }
  0x56   : > { %v256_v5 = vstv %s991_s17  ;;  %s555_s3 = sadd.s32 1024, %s978_s4  ;;  %s1018_s7 = sld [smem:[#allocation7 + %s351_s28]] }
  0x57   : > { %v233_v6 = vstv %s994_s1  ;;  %s804_s17 = smov 126   ;;  %s805_s14 = smov 127  }
  0x58   : > { %v279_v8 = vstv %s1000_s26  ;;  %s374_s1 = sadd.s32 %s555_s3, %s981_s19  ;;  %s1025_s4 = scalar_lea.vmem [#allocation8], %s523_s18 }
  0x59   : > { %v294_v13 = vstv %s1003_s20  ;;  %s375_s23 = sld [smem:[#allocation7 + %s374_s1]]  ;;  %s535_s18 = sshll.u32 %s780_s12, 1 }
  0x5a   : > { %v340_v19 = vstv %s1007_s25  ;;  %s536_s19 = sshll.u32 %s784_s13, 3  ;;  %s411_s26 = sshll.u32 %s1025_s4, 4  ;;  %s1093_s26 = int_to_ptr.vmem [resolvable:$true] %s411_s26 }
  0x5b   : > { %v317_v23 = vstv %s1011_s6  ;;  %s408_s27 = sadd.s32 %s536_s19, %s535_s18  ;;  %s396_s29 = scalar_lea.sflag [#allocation5], %s963_s22 }
  0x5c   : > { %v355_v30 = vstv %s1018_s7  ;;  %s537_s21 = sshll.u32 %s408_s27, 7  ;;  %s696_s24 = scalar_lea.vmem %s1093_s26, 256 }
  0x5d   : > { %s1098_s20 = scalar_lea.hbm %s1155_s2, %s537_s21  ;;  %p697_p1 = scmp.ne.s32.totalorder %s1093_s26, %s696_s24 }
  0x5e   : > { %s806_s25 = smov [#allocation8]  }
  0x5f   : > { %v378_v33 = vstv %s375_s23  ;;  %p698_p4 = pnand %p697_p1, %p923_p13  ;;  %s700_s6 = sshll.u32 %s806_s25, 4  ;;  %s701_s6 = int_to_ptr.vmem [resolvable:$false] %s700_s6 }
  0x60   : > { %s702_s28 = scalar_lea.vmem %s701_s6, 512  ;;  %p703_p3 = scmp.lt.s32.totalorder %s1093_s26, %s701_s6 }
  0x61   : > { %p699_p8 = pneg %p698_p4  ;;  %p704_p2 = scmp.lt.s32.totalorder %s702_s28, %s696_s24 }
  0x63   : > { %p705_p5 = por %p704_p2, %p703_p3 }
  0x65   : > { %p706_p7 = pnand %p705_p5, %p699_p8 }
  0xbc   : > { %v206_v3 = vpop.permute.xlu0 %205 }
  0xbd   : > { %212 = vst.msk [vmem:[#allocation2 + $0x1] sm:$0xff] %vm211_vm2, %v206_v3 }
  0xc0   : > { %v208_v4 = vpop.permute.xlu0 %207 }
  0xc1   : > { %213 = vst.msk [vmem:[#allocation2 + $0x9] sm:$0xff] %vm211_vm2, %v208_v4 }
  0xc4   : > { %v254_v9 = vld [vmem:[#allocation2] sm:$0xff] }
  0xc5   : > { %v292_v10 = vld [vmem:[#allocation2 + $0x1] sm:$0xff]  ;;  %v257_v11 = vmul.f32 %v256_v5, %v254_v9  ;;  %v234_v12 = vmul.f32 %v254_v9, %v233_v6  ;;  %v218_v14 = vmul.f32 %v254_v9, %v217_v7 }
  0xc6   : > { %v280_v15 = vmul.f32 %v292_v10, %v279_v8  ;;  %v295_v21 = vmul.f32 %v294_v13, %v292_v10  ;;  %v318_v28 = vmul.f32 %v317_v23, %v292_v10 }
  0xc7   : > { %263 = vrot.lane.b32.xlu0 %v257_v11, %s804_s17  ;;  %240 = vrot.lane.b32.xlu1 %v234_v12, %s805_s14  ;;  %221 = vst.msk [vmem:[%s1025_s4] sm:$0xff] %vm220_vm3, %v218_v14 }
  0xc8   : > { %v232_v16 = vld [vmem:[#allocation2 + $0x8] sm:$0xff] }
  0xc9   : > { %v353_v17 = vld [vmem:[#allocation2 + $0x2] sm:$0xff]  ;;  %v235_v20 = vmul.f32 %v233_v6, %v232_v16  ;;  %v354_v22 = vld [vmem:[#allocation2 + $0xa] sm:$0xff]  ;;  %v219_v24 = vmul.f32 %v232_v16, %v217_v7  ;;  %v258_v29 = vmul.f32 %v256_v5, %v232_v16 }
  0xca   : > { %v293_v18 = vld [vmem:[#allocation2 + $0x9] sm:$0xff]  ;;  %v341_v25 = vmul.f32 %v353_v17, %v340_v19  ;;  %v342_v27 = vmul.f32 %v354_v22, %v340_v19  ;;  %v356_v31 = vmul.f32 %v355_v30, %v353_v17  ;;  %v379_v34 = vmul.f32 %v378_v33, %v353_v17 }
  0xcb   : > { %301 = vrot.lane.b32.xlu0 %v295_v21, %s805_s14  ;;  %242 = vrot.lane.b32.xlu1 %v235_v20, %s805_s14  ;;  %v281_v26 = vmul.f32 %v293_v18, %v279_v8  ;;  %222 = vst.msk [vmem:[%s1025_s4 + $0x8] sm:$0xff] %vm220_vm3, %v219_v24  ;;  %v296_v32 = vmul.f32 %v294_v13, %v293_v18 }
  0xcc   : > { %v319_v35 = vmul.f32 %v317_v23, %v293_v18  ;;  %v357_v36 = vmul.f32 %v355_v30, %v354_v22  ;;  %v380_v37 = vmul.f32 %v378_v33, %v354_v22 }
  0xce   : > { %v236_v39 = vld [vmem:[%s1025_s4] sm:$0xff] }
  0xcf   : > { %324 = vrot.lane.b32.xlu0 %v318_v28, %s804_s17  ;;  %265 = vrot.lane.b32.xlu1 %v258_v29, %s804_s17 }
  0xd2   : > { %v237_v42 = vld [vmem:[%s1025_s4 + $0x8] sm:$0xff] }
  0xd3   : > { %362 = vrot.lane.b32.xlu0 %v356_v31, %s805_s14  ;;  %303 = vrot.lane.b32.xlu1 %v296_v32, %s805_s14 }
  0xd7   : > { %385 = vrot.lane.b32.xlu0 %v379_v34, %s804_s17  ;;  %326 = vrot.lane.b32.xlu1 %v319_v35, %s804_s17 }
  0xdb   : > { %364 = vrot.lane.b32.xlu1 %v357_v36, %s805_s14 }
  0xdf   : > { %387 = vrot.lane.b32.xlu1 %v380_v37, %s804_s17 }
 0x139   : > { %v241_v38 = vpop.permute.xlu1 %240  ;;  %v264_v44 = vpop.permute.xlu0 %263 }
 0x13a   : > { %v246_v40 = vadd.f32 %v241_v38, %v236_v39 }
 0x13c   : > { %248 = vst.msk [vmem:[%s1025_s4] sm:$0xff] %vm220_vm3, %v246_v40 }
 0x13d   : > { %v243_v41 = vpop.permute.xlu1 %242  ;;  %v302_v54 = vpop.permute.xlu0 %301 }
 0x13e   : > { %v247_v43 = vadd.f32 %v243_v41, %v237_v42 }
 0x140   : > { %249 = vst.msk [vmem:[%s1025_s4 + $0x8] sm:$0xff] %vm220_vm3, %v247_v43 }
 0x141   : > { %v266_v47 = vpop.permute.xlu1 %265  ;;  %v325_v60 = vpop.permute.xlu0 %324 }
 0x143   : > { %v259_v45 = vld [vmem:[%s1025_s4] sm:$0xff] }
 0x144   : > { %v269_v46 = vadd.f32 %v264_v44, %v259_v45 }
 0x145   : > { %v304_v57 = vpop.permute.xlu1 %303  ;;  %v363_v6 = vpop.permute.xlu0 %362 }
 0x146   : > { %271 = vst.msk [vmem:[%s1025_s4] sm:$0xff] %vm220_vm3, %v269_v46 }
 0x147   : > { %v260_v48 = vld [vmem:[%s1025_s4 + $0x8] sm:$0xff] }
 0x148   : > { %v270_v49 = vadd.f32 %v266_v47, %v260_v48 }
 0x149   : > { %v327_v63 = vpop.permute.xlu1 %326  ;;  %v386_v12 = vpop.permute.xlu0 %385 }
 0x14a   : > { %272 = vst.msk [vmem:[%s1025_s4 + $0x8] sm:$0xff] %vm220_vm3, %v270_v49 }
 0x14d   : > { %v282_v50 = vld [vmem:[%s1025_s4] sm:$0xff]  ;;  %v365_v9 = vpop.permute.xlu1 %364 }
 0x14e   : > { %v284_v51 = vadd.f32 %v282_v50, %v280_v15 }
 0x150   : > { %286 = vst.msk [vmem:[%s1025_s4] sm:$0xff] %vm220_vm3, %v284_v51 }
 0x151   : > { %v283_v52 = vld [vmem:[%s1025_s4 + $0x8] sm:$0xff]  ;;  %v388_v15 = vpop.permute.xlu1 %387 }
 0x152   : > { %v285_v53 = vadd.f32 %v283_v52, %v281_v26 }
 0x154   : > { %287 = vst.msk [vmem:[%s1025_s4 + $0x8] sm:$0xff] %vm220_vm3, %v285_v53 }
 0x157   : > { %v297_v55 = vld [vmem:[%s1025_s4] sm:$0xff] }
 0x158   : > { %v307_v56 = vadd.f32 %v302_v54, %v297_v55 }
 0x15a   : > { %309 = vst.msk [vmem:[%s1025_s4] sm:$0xff] %vm220_vm3, %v307_v56 }
 0x15b   : > { %v298_v58 = vld [vmem:[%s1025_s4 + $0x8] sm:$0xff] }
 0x15c   : > { %v308_v59 = vadd.f32 %v304_v57, %v298_v58 }
 0x15e   : > { %310 = vst.msk [vmem:[%s1025_s4 + $0x8] sm:$0xff] %vm220_vm3, %v308_v59 }
 0x161   : > { %v320_v61 = vld [vmem:[%s1025_s4] sm:$0xff] }
 0x162   : > { %v330_v62 = vadd.f32 %v325_v60, %v320_v61 }
 0x164   : > { %332 = vst.msk [vmem:[%s1025_s4] sm:$0xff] %vm220_vm3, %v330_v62 }
 0x165   : > { %v321_v0 = vld [vmem:[%s1025_s4 + $0x8] sm:$0xff] }
 0x166   : > { %v331_v1 = vadd.f32 %v327_v63, %v321_v0 }
 0x168   : > { %333 = vst.msk [vmem:[%s1025_s4 + $0x8] sm:$0xff] %vm220_vm3, %v331_v1 }
 0x16b   : > { %v343_v2 = vld [vmem:[%s1025_s4] sm:$0xff] }
 0x16c   : > { %v345_v3 = vadd.f32 %v343_v2, %v341_v25 }
 0x16e   : > { %347 = vst.msk [vmem:[%s1025_s4] sm:$0xff] %vm220_vm3, %v345_v3 }
 0x16f   : > { %v344_v4 = vld [vmem:[%s1025_s4 + $0x8] sm:$0xff] }
 0x170   : > { %v346_v5 = vadd.f32 %v344_v4, %v342_v27 }
 0x172   : > { %348 = vst.msk [vmem:[%s1025_s4 + $0x8] sm:$0xff] %vm220_vm3, %v346_v5 }
 0x175   : > { %v358_v7 = vld [vmem:[%s1025_s4] sm:$0xff] }
 0x176   : > { %v368_v8 = vadd.f32 %v363_v6, %v358_v7 }
 0x178   : > { %370 = vst.msk [vmem:[%s1025_s4] sm:$0xff] %vm220_vm3, %v368_v8 }
 0x179   : > { %v359_v10 = vld [vmem:[%s1025_s4 + $0x8] sm:$0xff] }
 0x17a   : > { %v369_v11 = vadd.f32 %v365_v9, %v359_v10 }
 0x17c   : > { %371 = vst.msk [vmem:[%s1025_s4 + $0x8] sm:$0xff] %vm220_vm3, %v369_v11 }
 0x17f   : > { %v381_v13 = vld [vmem:[%s1025_s4] sm:$0xff] }
 0x180   : > { %v391_v14 = vadd.f32 %v386_v12, %v381_v13 }
 0x182   : > { %393 = vst.msk [vmem:[%s1025_s4] sm:$0xff] %vm220_vm3, %v391_v14 }
 0x183   : > { %v382_v16 = vld [vmem:[%s1025_s4 + $0x8] sm:$0xff] }
 0x184   : > { %v392_v17 = vadd.f32 %v388_v15, %v382_v16 }
 0x186   : > { %394 = vst.msk [vmem:[%s1025_s4 + $0x8] sm:$0xff] %vm220_vm3, %v392_v17 }
 0x187   : > { %709 = shalt.err (!%p706_p7)
}
 0x188   : > { %s710_s3 = scalar_lea.hbm %s1098_s20, 256  ;;  %s714_s14 = scalar_lea.hbm %s1155_s2, 2048 }
 0x189   : > { %p711_p6 = scmp.ne.s32.totalorder %s1098_s20, %s710_s3  ;;  %p715_p12 = scmp.lt.s32.totalorder %s1098_s20, %s1155_s2 }
 0x18a   : > { %p716_p10 = scmp.lt.s32.totalorder %s714_s14, %s710_s3 }
 0x18b   : > { %p712_p9 = pnand %p711_p6, %p923_p13 }
 0x18c   : > { %p717_p0 = por %p716_p10, %p715_p12 }
 0x18d   : > { %p713_p11 = pneg %p712_p9 }
 0x18f   : > { %p718_p1 = pnand %p717_p0, %p713_p11 }
 0x191   : > { %721 = shalt.err (!%p718_p1)
}
 0x192   : > { %s807_s23 = smov 128   ;;  %s808_s18 = smov 8  }
 0x193   : > { %562 = dma.vmem_to_hbm [thread:$0]  (%p923_p13), %s1093_s26, 256, %s1098_s20, %s396_s29, %s807_s23, %s807_s23, %s808_s18  }
 0x194 PF: > { %s1177_s19 = sld [smem:[#allocation13_spill]]  ;;  %p579_p4 = scmp.ge.s32.totalorder %s796_s16, 2 }
 0x195   : > { %s426_s27 = sand.u32 1, %s768_s9  }
 0x196   : > { %s427_s21 = scalar_lea.sflag [#allocation5], %s426_s27 }
 0x19a   : > { %p1178_p8 = scmp.ne.s32.totalorder %s1177_s19, 0 }
 0x19c   : > { %p573_p3 = pnand %p579_p4, %p1178_p8 }
 0x19e   : > { %p574_p2 = pneg %p573_p3 }
 0x1a0   : > { %763 = dma.done.wait (%p574_p2), %s427_s21, 256  }
 0x1a1   : > { %765 = vsyncadd (%p574_p2), %s427_s21, 4294967040  ;;  %s19_s16 = sadd.s32 1, %s796_s16   ;;  %s1179_s12 = sld [smem:[#allocation12_spill]] }
 0x1a2   : > { %p16_p5 = scmp.ge.s32.totalorder %s19_s16, 10   ;;  %s1180_s14 = sld [smem:[#allocation14_spill]] }
 0x1a3   : > { %s1181_s9 = smov %s772_s10  ;;  %s1182_s10 = smov %s776_s11 }
 0x1a4   : > { %s1183_s11 = smov %s940_s30  ;;  %s1184_s13 = smov %s792_s15 }
 0x1a5   : > { %s1185_s15 = smov %s1191_s5  ;;  %18 = sbr.rel (!%p16_p5) target bundleno = 10 (0xa), region = 78 }
 0x1aa   :  { %432 = vsyncpa [#allocation4], 1 }
 0x1ab   :  { %434 = vsyncpa [#allocation4 + $0x1], 1 }
 0x1ac   :  { %435 = vsyncpa [#allocation5], 1 }
 0x1ad   :  { %437 = vsyncpa [#allocation5 + $0x1], 1 }
 0x1ae   :  { %438 = vsyncpa [#allocation6], 1 }
 0x1af   :  { %440 = vsyncpa [#allocation6 + $0x1], 1 }

</bundles_post_ra>
